<compile_context>
chip_gen: v6e
topology: v6e:2x2x1
jax: 0.10.0
libtpu: 0.0.40
codegen_flags: <defaults>
</compile_context>

<pallas_src>
import jax
import jax.numpy as jnp
from jax import lax
from jax.experimental import pallas as pl
from jax.experimental.pallas import tpu as pltpu


def _gumbel_argmax_kernel(logp_ref, noise_ref, out_ref):
    # s[b, i] = log_p[b, i] + g[b, i];  sampled index = argmax_i s[b, i]
    s = logp_ref[...].astype(jnp.float32) + noise_ref[...].astype(jnp.float32)
    n = s.shape[-1]

    # argmax along the lane axis, ties -> lowest index (same as torch/jnp):
    #   max reduce, then min-index of the lanes attaining the max.
    m = jnp.max(s, axis=-1, keepdims=True)                      # (TB, 1)
    lane = lax.broadcasted_iota(jnp.int32, s.shape, 1)          # (TB, N)
    idx = jnp.min(jnp.where(s == m, lane, n), axis=-1)          # (TB,)

    # Clamp guards pathological rows (e.g. NaN); a row of all -inf log-probs
    # (zero total mass) returns index 0 where torch.multinomial would raise —
    # documented precondition.
    out_ref[...] = jnp.minimum(idx, n - 1)[None, :].astype(jnp.int32)  # (1, TB)


def categorical_sample(log_p, key):
    """Pallas equivalent of torch.multinomial(log_p.exp(), 1).long().squeeze(1).

    log_p: (B, N) float array (f32 or bf16) of log-probabilities (rows may be
           unnormalized; sampling is invariant to a per-row additive constant).
    key:   jax.random key driving the draw.
    Returns (B,) int32 sampled category indices.
    """
    B, N = log_p.shape

    # Gumbel noise, same dtype as log_p to keep HBM traffic minimal.
    noise = jax.random.gumbel(key, (B, N), dtype=log_p.dtype)

    # Batch tile: lane-dense output blocks need TB to be a multiple of 128
    # (or a single full-B block). Tile only when it divides B cleanly.
    TB = B
    for cand in (512, 256, 128):
        if B >= cand and B % cand == 0:
            TB = cand
            break
    grid = (B // TB,)

    out = pl.pallas_call(
        _gumbel_argmax_kernel,
        out_shape=jax.ShapeDtypeStruct((1, B), jnp.int32),      # lane-dense
        grid=grid,
        in_specs=[
            pl.BlockSpec((TB, N), lambda i: (i, 0)),            # log_p tile
            pl.BlockSpec((TB, N), lambda i: (i, 0)),            # gumbel tile
        ],
        out_specs=pl.BlockSpec((1, TB), lambda i: (0, i)),
        compiler_params=pltpu.CompilerParams(
            dimension_semantics=("parallel",)),
    )(log_p, noise)

    return out[0]  # (B,)


if __name__ == "__main__":
    key = jax.random.PRNGKey(0)
    k_logits, k_sample = jax.random.split(key)

    B, N = 8, 128  # small demo shape: 8 rows of 128-way categorical log-probs

    logits = jax.random.normal(k_logits, (B, N), dtype=jnp.float32)
    log_p = jax.nn.log_softmax(logits, axis=-1)

    samples = categorical_sample(log_p, k_sample)
    samples = jax.block_until_ready(samples)

    assert samples.shape == (B,), samples.shape
    assert samples.dtype == jnp.int32, samples.dtype
    assert bool(jnp.all((samples >= 0) & (samples < N)))

    print("KERNEL_OK")
</pallas_src>

<mosaic_0001>
module attributes {stable_mosaic.version = 11 : i64} {
  func.func @_gumbel_argmax_kernel(%arg0: i32, %arg1: memref<8x128xf32, #tpu.memory_space<vmem>>, %arg2: memref<8x128xf32, #tpu.memory_space<vmem>>, %arg3: memref<1x8xi32, #tpu.memory_space<vmem>>) attributes {dimension_semantics = [#tpu.dimension_semantics<parallel>], iteration_bounds = array<i64: 1>, scalar_prefetch = 0 : i64, scratch_operands = 0 : i64, tpu.core_type = #tpu.core_type<tc>, window_params = [{transform_indices = @transform_0, window_bounds = array<i64: 8, 128>}, {transform_indices = @transform_1, window_bounds = array<i64: 8, 128>}, {transform_indices = @transform_2, window_bounds = array<i64: 1, 8>}]} {
    %c0 = arith.constant 0 : index
    %c0_0 = arith.constant 0 : index
    %0 = vector.load %arg1[%c0, %c0_0] : memref<8x128xf32, #tpu.memory_space<vmem>>, vector<8x128xf32>
    %c0_1 = arith.constant 0 : index
    %c0_2 = arith.constant 0 : index
    %1 = vector.load %arg2[%c0_1, %c0_2] : memref<8x128xf32, #tpu.memory_space<vmem>>, vector<8x128xf32>
    %2 = arith.addf %0, %1 : vector<8x128xf32>
    %cst = arith.constant dense<0xFF800000> : vector<8xf32>
    %3 = vector.multi_reduction <maximumf>, %2, %cst [1] : vector<8x128xf32> to vector<8xf32>
    %4 = vector.shape_cast %3 : vector<8xf32> to vector<8x1xf32>
    %5 = tpu.iota {dimensions = array<i32: 1>} : vector<8x128xi32>
    %6 = vector.broadcast %4 : vector<8x1xf32> to vector<8x128xf32>
    %7 = arith.cmpf oeq, %2, %6 : vector<8x128xf32>
    %c128_i32 = arith.constant 128 : i32
    %8 = vector.broadcast %c128_i32 : i32 to vector<8x128xi32>
    %9 = arith.select %7, %5, %8 : vector<8x128xi1>, vector<8x128xi32>
    %cst_3 = arith.constant dense<2147483647> : vector<8xi32>
    %10 = vector.multi_reduction <minsi>, %9, %cst_3 [1] : vector<8x128xi32> to vector<8xi32>
    %c127_i32 = arith.constant 127 : i32
    %11 = vector.broadcast %c127_i32 : i32 to vector<8xi32>
    %12 = arith.minsi %10, %11 : vector<8xi32>
    %13 = vector.shape_cast %12 : vector<8xi32> to vector<1x8xi32>
    %c0_4 = arith.constant 0 : index
    %c0_5 = arith.constant 0 : index
    %14 = vector.load %arg3[%c0_4, %c0_5] : memref<1x8xi32, #tpu.memory_space<vmem>>, vector<1x8xi32>
    tpu.vector_store %arg3[%c0_4, %c0_5], %13 {strides = array<i32>} : memref<1x8xi32, #tpu.memory_space<vmem>>, vector<1x8xi32>,
    return
  }
  func.func @transform_0(%arg0: i32) -> (i32, i32) {
    %c0_i32 = arith.constant 0 : i32
    %c0_i32_0 = arith.constant 0 : i32
    return %arg0, %c0_i32 : i32, i32
  }
  func.func @transform_1(%arg0: i32) -> (i32, i32) {
    %c0_i32 = arith.constant 0 : i32
    %c0_i32_0 = arith.constant 0 : i32
    return %arg0, %c0_i32 : i32, i32
  }
  func.func @transform_2(%arg0: i32) -> (i32, i32) {
    %c0_i32 = arith.constant 0 : i32
    %c0_i32_0 = arith.constant 0 : i32
    return %c0_i32, %arg0 : i32, i32
  }
}

</mosaic_0001>

<bundles_post_ra>
// kernel: tpu_custom_call.1
= control target key start
LH: loop header
LB: loop body
LE: loop exit
PB: predicated region body
PF: predicated region fallthrough
CT: control target
= control target key end

     0   :  { %7 = vsyncpa [#allocation3], 0  ;;  %s179_s0 = inlined_call_operand.hbm [shape: f32[8,128], index: 0, kind: input, shape index: {}]   ;;  %s180_s1 = inlined_call_operand.hbm [shape: f32[8,128], index: 1, kind: input, shape index: {}]   ;;  %s181_s2 = inlined_call_operand.hbm [shape: s32[1,8], index: 2, kind: output, shape index: {}]  }
   0x1   :  { %8 = vsyncpa [#allocation6], 0 }
   0x2   :  { %9 = vsyncpa [#allocation4], 0  ;;  %s152_s9 = smov [#allocation2]   ;;  %s153_s11 = smov [#allocation5]  }
   0x3   :  { %s16_s10 = sshll.u32 %s152_s9, 4  ;;  %s26_s12 = sshll.u32 %s153_s11, 4  ;;  %s17_s10 = int_to_ptr.vmem [resolvable:$true] %s16_s10  ;;  %s27_s12 = int_to_ptr.vmem [resolvable:$true] %s26_s12 }
   0x4   :  { %s94_s13 = scalar_lea.vmem %s17_s10, 128  ;;  %p99_p1 = scmp.lt.s32.totalorder %s17_s10, %s17_s10 }
   0x5   :  { %p95_p0 = scmp.ne.s32.totalorder %s17_s10, %s94_s13  ;;  %p100_p2 = scmp.lt.s32.totalorder %s94_s13, %s94_s13 }
   0x7   :  { %p101_p3 = por %p100_p2, %p99_p1 }
   0x9   :  { %p102_p4 = pnand %p101_p3, %p95_p0 }
   0xb   :  { %105 = shalt.err (!%p102_p4)
}
   0xc   :  { %19 = dma.hbm_to_vmem [thread:$0]  %s179_s0, 128, %s17_s10, [#allocation3]  }
   0xd   :  { %s114_s16 = scalar_lea.vmem %s27_s12, 128  ;;  %p119_p6 = scmp.lt.s32.totalorder %s27_s12, %s27_s12 }
   0xe   :  { %p115_p5 = scmp.ne.s32.totalorder %s27_s12, %s114_s16  ;;  %p120_p7 = scmp.lt.s32.totalorder %s114_s16, %s114_s16 }
  0x10   :  { %p121_p8 = por %p120_p7, %p119_p6 }
  0x12   :  { %p122_p9 = pnand %p121_p8, %p115_p5 }
  0x14   :  { %125 = shalt.err (!%p122_p9)
}
  0x15   :  { %29 = dma.hbm_to_vmem [thread:$0]  %s180_s1, 128, %s27_s12, [#allocation6]  }
  0x16   :  { %146 = dma.done.wait [#allocation3], 128  }
  0x17   :  { %147 = vsyncadd [#allocation3], 4294967168 }
  0x18   :  { %148 = dma.done.wait [#allocation6], 128  }
  0x19   :  { %149 = vsyncadd [#allocation6], 4294967168  ;;  %v36_v0 = vld [vmem:[#allocation2] sm:$0xff]  ;;  %v37_v1 = vld [vmem:[#allocation5] sm:$0xff]  ;;  %v41_v3 = vlaneseq  ;;  %s154_s0 = smov [#allocation7]   ;;  %vm65_vm3 = vcmask 57344  }
  0x1a   :  { %v38_v2 = vadd.f32 %v37_v1, %v36_v0  ;;  %s73_s1 = sshll.u32 %s154_s0, 4  ;;  %s74_s1 = int_to_ptr.vmem [resolvable:$true] %s73_s1 }
  0x1b   :  { %v42_v4 = vand.u32 127, %v41_v3  ;;  %v62_v14 = vshrl.u32 %v41_v3, 7  ;;  %s126_s19 = scalar_lea.vmem %s74_s1, 16  ;;  %s130_s20 = scalar_lea.vmem %s74_s1, 32 }
  0x1c   :  { %39 = vmax.xlane.f32.xlu0 %v38_v2  ;;  %p127_p10 = scmp.ne.s32.totalorder %s74_s1, %s126_s19  ;;  %p131_p11 = scmp.lt.s32.totalorder %s74_s1, %s74_s1 }
  0x1d   :  { %v63_v18 = vsub.s32 %v42_v4, %v62_v14  ;;  %p132_p12 = scmp.lt.s32.totalorder %s130_s20, %s126_s19 }
  0x1f   :  { %p133_p13 = por %p132_p12, %p131_p11 }
  0x21   :  { %p134_p0 = pnand %p133_p13, %p127_p10 }
  0xa5   :  { %v40_v5 = vpop.xlane.xlu0 %39 }
  0xa6   :  { %vm43_vm0 = vcmp.eq.f32.partialorder %v38_v2, %v40_v5 }
  0xa7   :  { %v44_v6 = vsel %vm43_vm0, %v42_v4, 128 }
  0xa8   :  { %v46_v7 = vshra.s32 %v44_v6, 16  ;;  %v45_v9 = vand.u32 65535, %v44_v6 }
  0xaa   :  { %v48_v8 = vcvt.s32.f32 %v46_v7  ;;  %v47_v11 = vcvt.s32.f32 %v45_v9 }
  0xac   :  { %49 = vmin.xlane.f32.xlu0 %v48_v8 }
 0x135   :  { %v50_v10 = vpop.xlane.xlu0 %49 }
 0x136   :  { %vm51_vm1 = vcmp.eq.f32.partialorder %v48_v8, %v50_v10  ;;  %v56_v13 = vcvt.f32.s32 %v50_v10 }
 0x137   :  { %v52_v12 = vsel %vm51_vm1, %v47_v11, inf }
 0x138   :  { %53 = vmin.xlane.f32.xlu1 %v52_v12  ;;  %v57_v16 = vshll.u32 %v56_v13, 16 }
 0x1c1   :  { %v54_v15 = vpop.xlane.xlu1 %53 }
 0x1c2   :  { %v55_v17 = vcvt.f32.s32 %v54_v15 }
 0x1c4   :  { %v58_v19 = vadd.s32 %v57_v16, %v55_v17 }
 0x1c6   :  { %vm59_vm2 = vcmp.lt.s32.totalorder %v58_v19, 127 }
 0x1c7   :  { %v60_v20 = vsel %vm59_vm2, %v58_v19, 127 }
 0x1c8   :  { %v64_v21 = vrot.slane %v60_v20, %v63_v18 }
 0x1ca   :  { %66 = vst.msk [vmem:[#allocation7] sm:$0x1] %vm65_vm3, %v64_v21 }
 0x1cb   :  { %137 = shalt.err (!%p134_p0)
}
 0x1cc   :  { %76 = dma.vmem_to_hbm [thread:$0]  %s74_s1, 16, %s181_s2, [#allocation4]  }
 0x1cd   :  { %150 = dma.done.wait [#allocation4], 16  }
 0x1ce   :  { %151 = vsyncadd [#allocation4], 4294967280 }
 0x1cf   :  { %80 = vsyncpa [#allocation3], 1 }
 0x1d0   :  { %81 = vsyncpa [#allocation6], 1 }
 0x1d1   :  { %82 = vsyncpa [#allocation4], 1 }

</bundles_post_ra>
